<compile_context>
chip_gen: v6e
topology: v6e:2x2x1
jax: 0.10.0
libtpu: 0.0.40
codegen_flags: <defaults>
</compile_context>

<pallas_src>
import functools

import jax
import jax.numpy as jnp
from jax.experimental import pallas as pl
from jax.experimental.pallas import tpu as pltpu

_LANES = 128
_SUBLANES = 8


def _round_up(x, m):
    return ((x + m - 1) // m) * m


def _l1_partial_kernel(a_ref, b_ref, out_ref, *, row_block, n_valid, needs_mask):
    # a_ref, b_ref: (row_block, 128) input tiles.
    # out_ref: (8, 128) per-block partial-sum tile (distinct per grid step).
    a = a_ref[...].astype(jnp.float32)
    b = b_ref[...].astype(jnp.float32)
    absdiff = jnp.abs(a - b)

    if needs_mask:
        # Zero out elements past the original (unpadded) element count.  Only
        # emitted when the last block overhangs the array; pure VPU work that
        # hides under the DMA of the next tile.
        i = pl.program_id(0)
        full_rows = n_valid // _LANES
        rem = n_valid % _LANES
        row = jax.lax.broadcasted_iota(jnp.int32, absdiff.shape, 0) + i * row_block
        lane = jax.lax.broadcasted_iota(jnp.int32, absdiff.shape, 1)
        mask = (row < full_rows) | ((row == full_rows) & (lane < rem))
        absdiff = jnp.where(mask, absdiff, 0.0)

    # VPU-only partial reduction: fold the (row_block, 128) tile into one
    # (8, 128) vreg-shaped partial; the cross-lane/sublane reduction happens
    # once in the wrapper over a tiny array (tree-like, better numerics).
    out_ref[...] = jnp.sum(absdiff.reshape(-1, _SUBLANES, _LANES), axis=0)


@functools.partial(jax.jit, static_argnames=("block_rows",))
def l1_loss_pallas(image_a, image_b, block_rows=2048):
    assert image_a.shape == image_b.shape, "l1_loss requires matching shapes"
    n_elem = image_a.size

    a_flat = image_a.reshape(-1)
    b_flat = image_b.reshape(-1)

    # Pad only to an (8,128) granule (<= 1023 elements), NOT to the block
    # granule.  For typical image tensors n_elem is already a multiple of 1024
    # and this is a no-op (no HBM copy).  Pad zeros contribute |0-0| = 0.
    granule = _SUBLANES * _LANES
    padded = _round_up(n_elem, granule)
    if padded != n_elem:
        a_flat = jnp.pad(a_flat, (0, padded - n_elem))
        b_flat = jnp.pad(b_flat, (0, padded - n_elem))

    rows = padded // _LANES
    a2d = a_flat.reshape(rows, _LANES)
    b2d = b_flat.reshape(rows, _LANES)

    # Tile choice: 2048x128 f32 = 1 MiB/input/step; 2 inputs x 2 pipeline
    # buffers = 4 MiB -> well inside the scoped-VMEM default on v5e/v6e/v7x.
    row_block = min(block_rows, rows)
    row_block = _round_up(row_block, _SUBLANES)
    num_blocks = pl.cdiv(rows, row_block)

    # Masking is only required when the last block overhangs the padded array
    # (padded zeros in the tail are harmless for an L1 sum).
    needs_mask = (rows % row_block) != 0

    kernel = functools.partial(
        _l1_partial_kernel,
        row_block=row_block,
        n_valid=n_elem,
        needs_mask=needs_mask,
    )

    itemsize = jnp.dtype(image_a.dtype).itemsize
    cost = pl.CostEstimate(
        flops=3 * n_elem,                       # sub + abs + add per element
        transcendentals=0,
        bytes_accessed=2 * padded * itemsize
        + num_blocks * _SUBLANES * _LANES * 4,  # tiny partial-sum output
    )

    partials = pl.pallas_call(
        kernel,
        out_shape=jax.ShapeDtypeStruct((num_blocks * _SUBLANES, _LANES), jnp.float32),
        grid_spec=pltpu.PrefetchScalarGridSpec(
            num_scalar_prefetch=0,
            grid=(num_blocks,),
            in_specs=[
                pl.BlockSpec((row_block, _LANES), lambda i: (i, 0)),
                pl.BlockSpec((row_block, _LANES), lambda i: (i, 0)),
            ],
            out_specs=pl.BlockSpec((_SUBLANES, _LANES), lambda i: (i, 0)),
        ),
        compiler_params=pltpu.CompilerParams(
            # No cross-step state -> grid axis is truly parallel (lets the
            # runtime shard across both TensorCores on v7x).
            dimension_semantics=("parallel",),
        ),
        cost_estimate=cost,
    )(a2d, b2d)

    # Mean over the ORIGINAL (unpadded) element count, matching
    # torch.nn.functional.l1_loss default reduction='mean'.
    return (jnp.sum(partials) / jnp.float32(n_elem)).astype(jnp.float32)


if __name__ == "__main__":
    key = jax.random.PRNGKey(0)
    k_a, k_b = jax.random.split(key)

    # Small NCHW inputs consistent with an image pair: (batch=2, C=4, 16, 16)
    image_a = jax.random.normal(k_a, (2, 4, 16, 16), dtype=jnp.float32)
    image_b = jax.random.normal(k_b, (2, 4, 16, 16), dtype=jnp.float32)

    loss = l1_loss_pallas(image_a, image_b)
    loss = jax.block_until_ready(loss)

    ref = jnp.mean(jnp.abs(image_a - image_b))
    assert jnp.allclose(loss, ref, rtol=1e-6, atol=1e-6), (loss, ref)

    # Exercise the ragged-last-block + mask path with a multi-step grid:
    # 2*3*16*32 = 3072 elements -> 24 rows, block_rows=16 -> grid=2, last block
    # overhangs 8 rows and must be masked.
    k_c, k_d = jax.random.split(k_b)
    image_c = jax.random.normal(k_c, (2, 3, 16, 32), dtype=jnp.float32)
    image_d = jax.random.normal(k_d, (2, 3, 16, 32), dtype=jnp.float32)
    loss2 = jax.block_until_ready(l1_loss_pallas(image_c, image_d, block_rows=16))
    ref2 = jnp.mean(jnp.abs(image_c - image_d))
    assert jnp.allclose(loss2, ref2, rtol=1e-6, atol=1e-6), (loss2, ref2)

    print("KERNEL_OK")
</pallas_src>

<mosaic_0001>
module attributes {stable_mosaic.version = 11 : i64} {
  func.func @_l1_partial_kernel(%arg0: i32, %arg1: memref<16x128xf32, #tpu.memory_space<vmem>>, %arg2: memref<16x128xf32, #tpu.memory_space<vmem>>, %arg3: memref<8x128xf32, #tpu.memory_space<vmem>>) attributes {dimension_semantics = [#tpu.dimension_semantics<parallel>], iteration_bounds = array<i64: 1>, scalar_prefetch = 0 : i64, scratch_operands = 0 : i64, tpu.core_type = #tpu.core_type<tc>, window_params = [{transform_indices = @transform_0, window_bounds = array<i64: 16, 128>}, {transform_indices = @transform_1, window_bounds = array<i64: 16, 128>}, {transform_indices = @transform_2, window_bounds = array<i64: 8, 128>}]} {
    %c0 = arith.constant 0 : index
    %c0_0 = arith.constant 0 : index
    %0 = vector.load %arg1[%c0, %c0_0] : memref<16x128xf32, #tpu.memory_space<vmem>>, vector<16x128xf32>
    %c0_1 = arith.constant 0 : index
    %c0_2 = arith.constant 0 : index
    %1 = vector.load %arg2[%c0_1, %c0_2] : memref<16x128xf32, #tpu.memory_space<vmem>>, vector<16x128xf32>
    %2 = arith.subf %0, %1 : vector<16x128xf32>
    %3 = math.absf %2 : vector<16x128xf32>
    %4 = vector.shape_cast %3 : vector<16x128xf32> to vector<2x8x128xf32>
    %cst = arith.constant dense<0.000000e+00> : vector<8x128xf32>
    %5 = vector.multi_reduction <add>, %4, %cst [0] : vector<2x8x128xf32> to vector<8x128xf32>
    %c0_3 = arith.constant 0 : index
    %c0_4 = arith.constant 0 : index
    %6 = vector.load %arg3[%c0_3, %c0_4] : memref<8x128xf32, #tpu.memory_space<vmem>>, vector<8x128xf32>
    tpu.vector_store %arg3[%c0_3, %c0_4], %5 {strides = array<i32>} : memref<8x128xf32, #tpu.memory_space<vmem>>, vector<8x128xf32>,
    return
  }
  func.func @transform_0(%arg0: i32) -> (i32, i32) {
    %c0_i32 = arith.constant 0 : i32
    %c0_i32_0 = arith.constant 0 : i32
    return %arg0, %c0_i32 : i32, i32
  }
  func.func @transform_1(%arg0: i32) -> (i32, i32) {
    %c0_i32 = arith.constant 0 : i32
    %c0_i32_0 = arith.constant 0 : i32
    return %arg0, %c0_i32 : i32, i32
  }
  func.func @transform_2(%arg0: i32) -> (i32, i32) {
    %c0_i32 = arith.constant 0 : i32
    %c0_i32_0 = arith.constant 0 : i32
    return %arg0, %c0_i32 : i32, i32
  }
}

</mosaic_0001>

<bundles_post_ra>
// kernel: l1_loss_pallas.1
= control target key start
LH: loop header
LB: loop body
LE: loop exit
PB: predicated region body
PF: predicated region fallthrough
CT: control target
= control target key end

     0   :  { %s55_s0 = inlined_call_operand.vmem [shape: f32[16,128], index: 0, kind: input, shape index: {}]   ;;  %s56_s1 = inlined_call_operand.vmem [shape: f32[16,128], index: 1, kind: input, shape index: {}]   ;;  %s57_s2 = inlined_call_operand.vmem [shape: f32[8,128], index: 2, kind: output, shape index: {}]  }
   0x1   :  { %v11_v0 = vld [vmem:[%s55_s0] sm:$0xff]  ;;  %v12_v1 = vld [vmem:[%s55_s0 + $0x8] sm:$0xff] }
   0x2   :  { %v13_v2 = vld [vmem:[%s56_s1] sm:$0xff]  ;;  %v14_v3 = vld [vmem:[%s56_s1 + $0x8] sm:$0xff] }
   0x3   :  { %v15_v4 = vsub.f32 %v11_v0, %v13_v2  ;;  %v16_v5 = vsub.f32 %v12_v1, %v14_v3 }
   0x5   :  { %v17_v6 = vand.u32 2147483647, %v15_v4  ;;  %v18_v7 = vand.u32 2147483647, %v16_v5 }
   0x7   :  { %v19_v8 = vadd.f32 %v18_v7, %v17_v6 }
   0x9   :  { %20 = vst [vmem:[%s57_s2] sm:$0xff] %v19_v8 }

</bundles_post_ra>
